<compile_context>
chip_gen: v5e
topology: v5e:2x2
jax: 0.10.0
libtpu: 0.0.40
codegen_flags: <defaults>
</compile_context>

<pallas_src>
import jax
import jax.numpy as jnp
from jax import lax
from jax.experimental import pallas as pl
from jax.experimental.pallas import tpu as pltpu

BN_EPS = 1e-5


# ----------------------------------------------------------------------------- helpers
def _cdiv(a, b):
    return -(-a // b)


def _round_up(a, b):
    return _cdiv(a, b) * b


def _vmem_budgets():
    """(stream_budget_bytes, vmem_limit_bytes), generation-aware."""
    cap = None
    try:
        info = pltpu.get_tpu_info()
        cap = getattr(info, "vmem_capacity_bytes", None)
    except Exception:
        cap = None
    if cap is None:
        cap = 128 * 1024 * 1024
    if cap <= 64 * 1024 * 1024:
        # v7x-class: 64 MiB physical VMEM -- leave headroom for compiler scratch,
        # the output block, the accumulator and semaphores.
        return 40 * 1024 * 1024, 48 * 1024 * 1024
    # v5e / v6e: 128 MiB physical VMEM.
    return 96 * 1024 * 1024, 112 * 1024 * 1024


def _choose_tiles(bs, d, itemsize, stream_budget, tb=None, tk=None):
    """Pick (tb, n_b, bs_pad, tk, n_k, d_pad) from the VMEM stream budget.

    Budget covers 2 inputs x 2 pipeline buffers x (tb, tk) x itemsize.
    Feature tile gets priority (fewer reduction steps -> per-step overhead amortized);
    the batch tile takes whatever budget remains (and enables megacore sharding when
    bs is large).  Tiles never need to divide the raw dims -- the wrapper zero-pads.
    """
    max_tile_elems = max(stream_budget // (4 * itemsize), 8 * 128)

    # Feature (reduction) tile.
    if tk is None:
        tk_budget = min(_round_up(d, 128),
                        max(128, ((max_tile_elems // 8) // 128) * 128))
        n_k = _cdiv(d, tk_budget)
        tk = _round_up(_cdiv(d, n_k), 128)   # distribute evenly, bounded over-padding
    else:
        assert tk % 128 == 0, "tk must be a multiple of 128"
        n_k = _cdiv(d, tk)
    d_pad = n_k * tk

    # Batch (parallel) tile.
    if tb is None:
        tb_budget = max(8, ((max_tile_elems // tk) // 8) * 8)
        if bs <= tb_budget:
            tb, n_b = bs, 1
        else:
            n_b = _cdiv(bs, tb_budget)
            tb = _round_up(_cdiv(bs, n_b), 8)
    else:
        if tb >= bs:
            tb, n_b = bs, 1
        else:
            assert tb % 8 == 0, "tb must be a multiple of 8 when it tiles the batch"
            n_b = _cdiv(bs, tb)
    bs_pad = n_b * tb

    return tb, n_b, bs_pad, tk, n_k, d_pad


# ----------------------------------------------------------------------------- kernel
def sqdist_kernel(smi_ref, fas_ref, d_ref, acc_ref):
    # smi_ref / fas_ref: VMEM (tb, tk) tiles of the streamed inputs
    # d_ref:             VMEM (tb, 1) f32 per-row squared distance (written once)
    # acc_ref:           VMEM (tb, 128) f32 lane-parallel partial-sum accumulator
    k = pl.program_id(1)

    @pl.when(k == 0)
    def _():
        acc_ref[...] = jnp.zeros_like(acc_ref)

    # Squared-difference contribution of this (tb, tk) tile, accumulated in f32.
    diff = smi_ref[...].astype(jnp.float32) - fas_ref[...].astype(jnp.float32)
    sq = diff * diff                                            # (tb, tk)

    # Fold the feature axis down to 128 lanes with vreg-aligned static slices:
    # pure VPU adds, no cross-lane movement, no MXU/XLU work per step.
    n_chunks = sq.shape[1] // 128
    part = sq[:, 0:128]
    for c in range(1, n_chunks):
        part = part + sq[:, c * 128:(c + 1) * 128]
    acc_ref[...] += part

    # Single cross-lane reduce per batch tile, after the whole feature dim is streamed.
    @pl.when(k == pl.num_programs(1) - 1)
    def _():
        d_ref[...] = jnp.sum(acc_ref[...], axis=1, keepdims=True)


# ----------------------------------------------------------------------------- wrapper
def predict_model(smi_common, fas_common, tag, params, *, tb=None, tk=None):
    """params: (4,) f32 = [linear_w, linear_b, bn_gamma, bn_beta]."""
    bs, D = smi_common.shape
    itemsize = jnp.dtype(smi_common.dtype).itemsize
    stream_budget, vmem_limit = _vmem_budgets()
    tb, n_b, bs_pad, tk, n_k, d_pad = _choose_tiles(
        bs, D, itemsize, stream_budget, tb=tb, tk=tk)

    # Zero-padding both inputs is numerically exact (diff = 0 -> contributes 0).
    if bs_pad != bs or d_pad != D:
        pad = ((0, bs_pad - bs), (0, d_pad - D))
        smi_p = jnp.pad(smi_common, pad)
        fas_p = jnp.pad(fas_common, pad)
    else:
        smi_p, fas_p = smi_common, fas_common

    d = pl.pallas_call(
        sqdist_kernel,
        out_shape=jax.ShapeDtypeStruct((bs_pad, 1), jnp.float32),
        grid=(n_b, n_k),
        in_specs=[
            # NOTE: leave the default double-buffering; bump to pl.Buffered(3) only if
            # profiling shows exposed DMA waits at tiny per-step tiles.
            pl.BlockSpec((tb, tk), lambda i, k: (i, k)),        # smi tile
            pl.BlockSpec((tb, tk), lambda i, k: (i, k)),        # fas tile
        ],
        out_specs=pl.BlockSpec((tb, 1), lambda i, k: (i, 0)),   # resident across k
        scratch_shapes=[pltpu.VMEM((tb, 128), jnp.float32)],
        compiler_params=pltpu.CompilerParams(
            dimension_semantics=("parallel", "arbitrary"),      # batch parallel, D reduce
            vmem_limit_bytes=int(vmem_limit),
        ),
    )(smi_p, fas_p)

    # O(bs) epilogue in plain JAX: Linear(1,1) -> train-mode BatchNorm1d(1) (global
    # batch statistics, biased variance) -> exact sigmoid.
    # TODO(synk): training-mode BatchNorm1d also updates running_mean/running_var
    # buffers as a side effect; only the forward output is reproduced here.
    dvec = d[:bs, 0]
    w, b, gamma, beta = params[0], params[1], params[2], params[3]
    z = dvec * w + b
    mean = jnp.mean(z)
    centered = z - mean
    var = jnp.mean(centered * centered)
    y = gamma * centered / jnp.sqrt(var + BN_EPS) + beta
    predict = jax.nn.sigmoid(y)
    return predict, tag


# ----------------------------------------------------------------------------- init/ref
def init_params(key):
    # nn.Linear(1, 1): weight, bias ~ U(-1/sqrt(fan_in), 1/sqrt(fan_in)) = U(-1, 1)
    kw, kb = jax.random.split(key)
    w = jax.random.uniform(kw, (), jnp.float32, minval=-1.0, maxval=1.0)
    b = jax.random.uniform(kb, (), jnp.float32, minval=-1.0, maxval=1.0)
    gamma = jnp.float32(1.0)   # BatchNorm1d weight at init
    beta = jnp.float32(0.0)    # BatchNorm1d bias at init
    return jnp.stack([w, b, gamma, beta]).astype(jnp.float32)


def _reference(smi, fas, params):
    d = jnp.sum((smi - fas) ** 2, axis=1, keepdims=True)
    z = d * params[0] + params[1]
    m = jnp.mean(z)
    v = jnp.mean((z - m) ** 2)
    y = params[2] * (z - m) / jnp.sqrt(v + BN_EPS) + params[3]
    return jax.nn.sigmoid(y).reshape(-1)


# ----------------------------------------------------------------------------- demo
if __name__ == "__main__":
    key = jax.random.PRNGKey(0)
    k_smi, k_fas, k_tag, k_par = jax.random.split(key, 4)
    params = init_params(k_par)

    # Case 1: small, lane-unaligned feature dim (exercises the zero-padding path).
    bs, D = 8, 32
    smi_common = jax.random.normal(k_smi, (bs, D), jnp.float32)
    fas_common = jax.random.normal(k_fas, (bs, D), jnp.float32)
    tag = jax.random.randint(k_tag, (bs,), 0, 2).astype(jnp.int32)

    predict, tag_out = predict_model(smi_common, fas_common, tag, params)
    jax.block_until_ready((predict, tag_out))
    p_ref = _reference(smi_common, fas_common, params)
    assert jnp.allclose(predict, p_ref, atol=1e-4, rtol=1e-4), (predict, p_ref)
    assert jnp.array_equal(tag_out, tag)

    # Case 2: forced small tiles -> 2x3 grid (batch-parallel tiles + multi-step feature
    # reduction with VMEM accumulator and pl.when finalize).
    bs2, D2 = 16, 384
    smi2 = jax.random.normal(jax.random.fold_in(k_smi, 1), (bs2, D2), jnp.float32)
    fas2 = jax.random.normal(jax.random.fold_in(k_fas, 1), (bs2, D2), jnp.float32)
    tag2 = jnp.arange(bs2, dtype=jnp.int32)

    predict2, tag2_out = predict_model(smi2, fas2, tag2, params, tb=8, tk=128)
    jax.block_until_ready(predict2)
    p_ref2 = _reference(smi2, fas2, params)
    assert jnp.allclose(predict2, p_ref2, atol=1e-4, rtol=1e-4), (predict2, p_ref2)
    assert jnp.array_equal(tag2_out, tag2)

    # Case 3: bf16 inputs (half HBM traffic); kernel upcasts to f32 before the math.
    bs3, D3 = 8, 256
    smi3 = jax.random.normal(jax.random.fold_in(k_smi, 2), (bs3, D3), jnp.float32)
    fas3 = jax.random.normal(jax.random.fold_in(k_fas, 2), (bs3, D3), jnp.float32)
    tag3 = jnp.arange(bs3, dtype=jnp.int32)
    predict3, _ = predict_model(smi3.astype(jnp.bfloat16),
                                fas3.astype(jnp.bfloat16), tag3, params)
    jax.block_until_ready(predict3)
    p_ref3 = _reference(smi3.astype(jnp.bfloat16).astype(jnp.float32),
                        fas3.astype(jnp.bfloat16).astype(jnp.float32), params)
    assert jnp.allclose(predict3, p_ref3, atol=1e-4, rtol=1e-4), (predict3, p_ref3)

    print("KERNEL_OK")
</pallas_src>

<mosaic_0001>
module attributes {stable_mosaic.version = 11 : i64} {
  func.func @sqdist_kernel(%arg0: i32, %arg1: i32, %arg2: memref<8x128xf32, #tpu.memory_space<vmem>>, %arg3: memref<8x128xf32, #tpu.memory_space<vmem>>, %arg4: memref<8x1xf32, #tpu.memory_space<vmem>>, %arg5: memref<8x128xf32, #tpu.memory_space<vmem>>) attributes {dimension_semantics = [#tpu.dimension_semantics<parallel>, #tpu.dimension_semantics<arbitrary>], iteration_bounds = array<i64: 1, 1>, scalar_prefetch = 0 : i64, scratch_operands = 1 : i64, tpu.core_type = #tpu.core_type<tc>, window_params = [{transform_indices = @transform_0, window_bounds = array<i64: 8, 128>}, {transform_indices = @transform_1, window_bounds = array<i64: 8, 128>}, {transform_indices = @transform_2, window_bounds = array<i64: 8, 1>}]} {
    %c0_i32 = arith.constant 0 : i32
    %0 = arith.cmpi eq, %arg1, %c0_i32 : i32
    %1 = arith.extui %0 : i1 to i32
    %c0_i32_0 = arith.constant 0 : i32
    %2 = arith.cmpi ne, %1, %c0_i32_0 : i32
    scf.if %2 {
      %cst = arith.constant 0.000000e+00 : f32
      %13 = vector.broadcast %cst : f32 to vector<8x128xf32>
      %c0_10 = arith.constant 0 : index
      %c0_11 = arith.constant 0 : index
      %14 = vector.load %arg5[%c0_10, %c0_11] : memref<8x128xf32, #tpu.memory_space<vmem>>, vector<8x128xf32>
      tpu.vector_store %arg5[%c0_10, %c0_11], %13 {strides = array<i32>} : memref<8x128xf32, #tpu.memory_space<vmem>>, vector<8x128xf32>,
    } else {
    }
    %c0 = arith.constant 0 : index
    %c0_1 = arith.constant 0 : index
    %3 = vector.load %arg2[%c0, %c0_1] : memref<8x128xf32, #tpu.memory_space<vmem>>, vector<8x128xf32>
    %c0_2 = arith.constant 0 : index
    %c0_3 = arith.constant 0 : index
    %4 = vector.load %arg3[%c0_2, %c0_3] : memref<8x128xf32, #tpu.memory_space<vmem>>, vector<8x128xf32>
    %5 = arith.subf %3, %4 : vector<8x128xf32>
    %6 = arith.mulf %5, %5 : vector<8x128xf32>
    %c0_4 = arith.constant 0 : index
    %c0_5 = arith.constant 0 : index
    %7 = vector.load %arg5[%c0_4, %c0_5] : memref<8x128xf32, #tpu.memory_space<vmem>>, vector<8x128xf32>
    %8 = arith.addf %7, %6 : vector<8x128xf32>
    %c0_6 = arith.constant 0 : index
    %c0_7 = arith.constant 0 : index
    %9 = vector.load %arg5[%c0_6, %c0_7] : memref<8x128xf32, #tpu.memory_space<vmem>>, vector<8x128xf32>
    tpu.vector_store %arg5[%c0_6, %c0_7], %8 {strides = array<i32>} : memref<8x128xf32, #tpu.memory_space<vmem>>, vector<8x128xf32>,
    %c0_i32_8 = arith.constant 0 : i32
    %10 = arith.cmpi eq, %arg1, %c0_i32_8 : i32
    %11 = arith.extui %10 : i1 to i32
    %c0_i32_9 = arith.constant 0 : i32
    %12 = arith.cmpi ne, %11, %c0_i32_9 : i32
    scf.if %12 {
      %c0_10 = arith.constant 0 : index
      %c0_11 = arith.constant 0 : index
      %13 = vector.load %arg5[%c0_10, %c0_11] : memref<8x128xf32, #tpu.memory_space<vmem>>, vector<8x128xf32>
      %cst = arith.constant dense<0.000000e+00> : vector<8xf32>
      %14 = vector.multi_reduction <add>, %13, %cst [1] : vector<8x128xf32> to vector<8xf32>
      %15 = vector.shape_cast %14 : vector<8xf32> to vector<8x1xf32>
      %c0_12 = arith.constant 0 : index
      %c0_13 = arith.constant 0 : index
      %16 = vector.load %arg4[%c0_12, %c0_13] : memref<8x1xf32, #tpu.memory_space<vmem>>, vector<8x1xf32>
      tpu.vector_store %arg4[%c0_12, %c0_13], %15 {strides = array<i32>} : memref<8x1xf32, #tpu.memory_space<vmem>>, vector<8x1xf32>,
    } else {
    }
    return
  }
  func.func @transform_0(%arg0: i32, %arg1: i32) -> (i32, i32) {
    %c0_i32 = arith.constant 0 : i32
    return %arg0, %arg1 : i32, i32
  }
  func.func @transform_1(%arg0: i32, %arg1: i32) -> (i32, i32) {
    %c0_i32 = arith.constant 0 : i32
    return %arg0, %arg1 : i32, i32
  }
  func.func @transform_2(%arg0: i32, %arg1: i32) -> (i32, i32) {
    %c0_i32 = arith.constant 0 : i32
    %c0_i32_0 = arith.constant 0 : i32
    return %arg0, %c0_i32 : i32, i32
  }
}

</mosaic_0001>

<bundles_post_ra>
// kernel: tpu_custom_call.1
= control target key start
LH: loop header
LB: loop body
LE: loop exit
PB: predicated region body
PF: predicated region fallthrough
CT: control target
= control target key end

     0   :  { %7 = vsyncpa [#allocation4], 0  ;;  %s145_s0 = inlined_call_operand.hbm [shape: f32[8,128], index: 0, kind: input, shape index: {}]   ;;  %s146_s1 = inlined_call_operand.hbm [shape: f32[8,128], index: 1, kind: input, shape index: {}]   ;;  %s147_s2 = inlined_call_operand.vmem [shape: f32[8,1], index: 2, kind: output, shape index: {}]  }
   0x1   :  { %s14_s11 = sshll.u32 %s145_s0, 4  ;;  %s15_s11 = int_to_ptr.hbm [resolvable:$true] %s14_s11 }
   0x2   :  { %8 = vsyncpa [#allocation6], 0  ;;  %s119_s12 = smov [#allocation3]   ;;  %s25_s16 = sshll.u32 %s146_s1, 4  ;;  %s26_s16 = int_to_ptr.hbm [resolvable:$true] %s25_s16 }
   0x3   :  { %s16_s13 = sshll.u32 %s119_s12, 4  ;;  %s120_s17 = smov [#allocation5]   ;;  %s17_s13 = int_to_ptr.vmem [resolvable:$true] %s16_s13 }
   0x4   :  { %19 = dma.hbm_to_vmem [thread:$0]  %s15_s11, 128, %s17_s13, [#allocation4]  }
   0x5   :  { %s27_s18 = sshll.u32 %s120_s17, 4  ;;  %s28_s18 = int_to_ptr.vmem [resolvable:$true] %s27_s18 }
   0x6   :  { %30 = dma.hbm_to_vmem [thread:$0]  %s26_s16, 128, %s28_s18, [#allocation6]  }
   0x7   :  { %115 = dma.done.wait [#allocation4], 128  }
   0x8   :  { %116 = vsyncadd [#allocation4], 4294967168 }
   0x9   :  { %117 = dma.done.wait [#allocation6], 128  }
   0xa   :  { %118 = vsyncadd [#allocation6], 4294967168  ;;  %v44_v0 = vld [vmem:[#allocation3] sm:$0xff]  ;;  %v45_v1 = vld [vmem:[#allocation5] sm:$0xff]  ;;  %vm57_vm0 = vcmask 7168  }
   0xb   :  { %v46_v2 = vsub.f32 %v44_v0, %v45_v1 }
   0xd   :  { %v47_v3 = vmul.f32 %v46_v2, %v46_v2 }
   0xf   :  { %55 = vadd.xlane.f32.xlu0 %v47_v3 }
  0x82   :  { %v56_v4 = vpop.xlane.xlu0 %55 }
  0x83   :  { %58 = vst.msk [vmem:[%s147_s2] sm:$0xff] %vm57_vm0, %v56_v4 }
  0x84   :  { %63 = vsyncpa [#allocation4], 1 }
  0x85   :  { %64 = vsyncpa [#allocation6], 1 }

</bundles_post_ra>
